<compile_context>
chip_gen: v7x
topology: tpu7x:2x2x1
jax: 0.10.0
libtpu: 0.0.40
codegen_flags: <defaults>
</compile_context>

<pallas_src>
import functools

import numpy as np
import jax
import jax.numpy as jnp
from jax.experimental import pallas as pl
from jax.experimental.pallas import tpu as pltpu

LANES = 128
SUBLANE_MULT = 16          # row padding multiple (covers f32 (8) and bf16 (16) tiling)
TARGET_BLOCK_ROWS = 2048   # (2048,128) f32 = 1 MiB per buffer; past knee of mem-bound tile curve


def _ema_kernel(shadow_ref, param_ref, omd_ref, out_ref):
    """Elementwise EMA update on one (BLOCK_ROWS, LANES) tile.

    omd_ref: SMEM f32[1] = [one_minus_decay]  (decay logic hoisted to wrapper).
    """
    omd = omd_ref[0]
    s = shadow_ref[...]
    p = param_ref[...].astype(jnp.float32)
    # shadow.sub_(one_minus_decay * (shadow - param))
    out_ref[...] = s - omd * (s - p)


def _ema_update_flat(shadow_2d, param_2d, omd, block_rows):
    rows = shadow_2d.shape[0]
    assert rows % block_rows == 0 and shadow_2d.shape[1] == LANES
    grid = (rows // block_rows,)

    def idx(i):
        return (i, 0)

    return pl.pallas_call(
        _ema_kernel,
        out_shape=jax.ShapeDtypeStruct((rows, LANES), jnp.float32),
        grid=grid,
        in_specs=[
            pl.BlockSpec((block_rows, LANES), idx),                     # shadow (f32)
            pl.BlockSpec((block_rows, LANES), idx),                     # params (f32 or bf16)
            pl.BlockSpec(memory_space=pltpu.MemorySpace.SMEM),          # one_minus_decay
        ],
        out_specs=pl.BlockSpec((block_rows, LANES), idx),
        compiler_params=pltpu.CompilerParams(
            dimension_semantics=("parallel",),   # shards blocks across TCs where available
        ),
        # input 0 = shadow slab -> aliased to output 0 (in-place EMA update)
        input_output_aliases={0: 0},
    )(shadow_2d, param_2d, omd)


@functools.partial(jax.jit, static_argnums=(4,), donate_argnums=(0,))
def _ema_step(shadow_2d, params, decay, num_updates, block_rows):
    """One full EMA step: flatten params, compute decay on-device, run kernel."""
    # --- flatten incoming params into a lane-dense slab matching the shadow ---
    dts = {jnp.dtype(v.dtype) for v in params.values()}
    pdt = jnp.bfloat16 if dts == {jnp.dtype(jnp.bfloat16)} else jnp.float32
    flat = jnp.concatenate([jnp.ravel(params[k]).astype(pdt) for k in sorted(params)])
    total = shadow_2d.shape[0] * LANES
    flat = jnp.pad(flat, (0, total - flat.shape[0]))
    param_2d = flat.reshape(shadow_2d.shape[0], LANES)

    # --- scalar bookkeeping (all on device, hoisted out of the kernel) ---
    nu = jnp.where(num_updates >= 0, num_updates + 1, num_updates).astype(jnp.int32)
    nu_f = nu.astype(jnp.float32)
    eff_decay = jnp.where(
        nu >= 0, jnp.minimum(decay, (1.0 + nu_f) / (10.0 + nu_f)), decay)
    omd = (1.0 - eff_decay).astype(jnp.float32).reshape((1,))

    new_shadow = _ema_update_flat(shadow_2d, param_2d, omd, block_rows)
    return new_shadow, nu


class LitEmaPallas:
    """JAX/Pallas port of LitEma for a dict of trainable parameters."""

    def __init__(self, params: dict, decay: float = 0.9999,
                 use_num_updates: bool = True):
        if decay < 0.0 or decay > 1.0:
            raise ValueError("Decay must be between 0 and 1")
        self.decay = jnp.float32(decay)
        self.num_updates = jnp.int32(0 if use_num_updates else -1)

        self._shapes = {k: tuple(v.shape) for k, v in params.items()}
        self._sizes = {k: int(np.prod(v.shape)) for k, v in params.items()}
        total = int(sum(self._sizes.values()))

        rows_needed = -(-total // LANES)
        rows_needed = -(-rows_needed // SUBLANE_MULT) * SUBLANE_MULT
        self._block_rows = int(min(TARGET_BLOCK_ROWS, rows_needed))
        self._rows = int(-(-rows_needed // self._block_rows) * self._block_rows)

        # Persistent flat shadow slab (f32); built once here, never re-flattened.
        flat = jnp.concatenate(
            [jnp.ravel(params[k]).astype(jnp.float32) for k in sorted(params)])
        flat = jnp.pad(flat, (0, self._rows * LANES - flat.shape[0]))
        self._shadow_flat = flat.reshape(self._rows, LANES)

        self.collected_params = []

    # ---- unflatten (lazy; only for copy_to / inspection) -----------------
    def _unflatten(self, flat2d: jax.Array) -> dict:
        flat = flat2d.reshape(-1)
        out, off = {}, 0
        for k in sorted(self._shapes):
            n = self._sizes[k]
            out[k] = flat[off:off + n].reshape(self._shapes[k])
            off += n
        return out

    @property
    def shadow(self) -> dict:
        return self._unflatten(self._shadow_flat)

    # ---- forward / update -------------------------------------------------
    def update(self, params: dict):
        return self.forward(params)

    def forward(self, params: dict):
        new_shadow, new_nu = _ema_step(
            self._shadow_flat,
            {k: params[k] for k in self._shapes},
            self.decay,
            self.num_updates,
            self._block_rows,
        )
        self._shadow_flat = new_shadow   # donated input replaced in place
        self.num_updates = new_nu        # stays on device, no host sync
        return new_shadow

    # ---- rest of the torch API (pure glue, no kernels needed) ------------
    def copy_to(self, params: dict) -> dict:
        shadow = self.shadow
        return {k: shadow[k] for k in params}

    def store(self, parameters):
        self.collected_params = [jnp.array(p) for p in parameters]

    def restore(self, parameters):
        # JAX arrays are immutable; return copies of the stored params in order.
        # TODO(synk): torch restore() mutates params in place; caller must rebind.
        return [jnp.array(p) for p in self.collected_params]

    def reset_num_updates(self):
        self.num_updates = jnp.int32(0)


# ---------------------------------------------------------------------------
def _reference_steps(shadow0, params_seq, decay, use_num_updates):
    """Pure-numpy reference of repeated LitEma.forward for verification."""
    shadow = {k: np.array(v, np.float32) for k, v in shadow0.items()}
    nu = 0 if use_num_updates else -1
    for params in params_seq:
        d = float(decay)
        if nu >= 0:
            nu += 1
            d = min(d, (1.0 + nu) / (10.0 + nu))
        omd = 1.0 - d
        for k in shadow:
            p = np.array(params[k], np.float32)
            shadow[k] = shadow[k] - np.float32(omd) * (shadow[k] - p)
    return shadow, nu


if __name__ == "__main__":
    key = jax.random.PRNGKey(0)
    k1, k2, k3, k4 = jax.random.split(key, 4)

    # A tiny synthetic "model": conv(4->8, 3x3) weight+bias and a linear 32->16.
    params0 = {
        "conv.weight": jax.random.normal(k1, (8, 4, 3, 3), jnp.float32),  # OIHW
        "conv.bias": jax.random.normal(k2, (8,), jnp.float32),
        "fc.weight": jax.random.normal(k3, (16, 32), jnp.float32),
        "fc.bias": jax.random.normal(k4, (16,), jnp.float32),
    }

    ema = LitEmaPallas(params0, decay=0.9999, use_num_updates=True)

    # Simulate three optimizer steps: params drift away from the shadow.
    steps = []
    cur = params0
    dkeys = jax.random.split(jax.random.PRNGKey(1), 3)
    for s in range(3):
        sub = jax.random.split(dkeys[s], len(cur))
        cur = {
            k: v + 0.1 * jax.random.normal(sub[i], v.shape, jnp.float32)
            for i, (k, v) in enumerate(sorted(cur.items()))
        }
        steps.append(cur)

    for p in steps:
        ema.forward(p)
    jax.block_until_ready(ema._shadow_flat)

    # verify against pure numpy reference
    ref_shadow, ref_nu = _reference_steps(params0, steps, 0.9999, True)
    got = ema.copy_to(params0)
    for k in ref_shadow:
        np.testing.assert_allclose(
            np.array(got[k]), ref_shadow[k], rtol=1e-5, atol=1e-5)
    assert int(ema.num_updates) == ref_nu, (int(ema.num_updates), ref_nu)

    print("KERNEL_OK")
</pallas_src>

<mosaic_0001>
module attributes {stable_mosaic.version = 11 : i64} {
  func.func @_ema_kernel(%arg0: i32, %arg1: memref<16x128xf32, #tpu.memory_space<vmem>>, %arg2: memref<16x128xf32, #tpu.memory_space<vmem>>, %arg3: memref<1xf32, #tpu.memory_space<smem>>, %arg4: memref<16x128xf32, #tpu.memory_space<vmem>>) attributes {dimension_semantics = [#tpu.dimension_semantics<parallel>], iteration_bounds = array<i64: 1>, scalar_prefetch = 0 : i64, scratch_operands = 0 : i64, tpu.core_type = #tpu.core_type<tc>, window_params = [{transform_indices = @transform_0, window_bounds = array<i64: 16, 128>}, {transform_indices = @transform_1, window_bounds = array<i64: 16, 128>}, {transform_indices = @transform_2, window_bounds = array<i64: 1>}, {transform_indices = @transform_3, window_bounds = array<i64: 16, 128>}]} {
    %c0 = arith.constant 0 : index
    %0 = memref.load %arg3[%c0] : memref<1xf32, #tpu.memory_space<smem>>
    %c0_0 = arith.constant 0 : index
    %c0_1 = arith.constant 0 : index
    %1 = vector.load %arg1[%c0_0, %c0_1] : memref<16x128xf32, #tpu.memory_space<vmem>>, vector<16x128xf32>
    %c0_2 = arith.constant 0 : index
    %c0_3 = arith.constant 0 : index
    %2 = vector.load %arg2[%c0_2, %c0_3] : memref<16x128xf32, #tpu.memory_space<vmem>>, vector<16x128xf32>
    %3 = arith.subf %1, %2 : vector<16x128xf32>
    %4 = vector.broadcast %0 : f32 to vector<16x128xf32>
    %5 = arith.mulf %4, %3 : vector<16x128xf32>
    %6 = arith.subf %1, %5 : vector<16x128xf32>
    %c0_4 = arith.constant 0 : index
    %c0_5 = arith.constant 0 : index
    %7 = vector.load %arg4[%c0_4, %c0_5] : memref<16x128xf32, #tpu.memory_space<vmem>>, vector<16x128xf32>
    tpu.vector_store %arg4[%c0_4, %c0_5], %6 {strides = array<i32>} : memref<16x128xf32, #tpu.memory_space<vmem>>, vector<16x128xf32>,
    return
  }
  func.func @transform_0(%arg0: i32) -> (i32, i32) {
    %c0_i32 = arith.constant 0 : i32
    %c0_i32_0 = arith.constant 0 : i32
    return %arg0, %c0_i32 : i32, i32
  }
  func.func @transform_1(%arg0: i32) -> (i32, i32) {
    %c0_i32 = arith.constant 0 : i32
    %c0_i32_0 = arith.constant 0 : i32
    return %arg0, %c0_i32 : i32, i32
  }
  func.func @transform_2(%arg0: i32) -> i32 {
    %c0_i32 = arith.constant 0 : i32
    %c0_i32_0 = arith.constant 0 : i32
    return %c0_i32 : i32
  }
  func.func @transform_3(%arg0: i32) -> (i32, i32) {
    %c0_i32 = arith.constant 0 : i32
    %c0_i32_0 = arith.constant 0 : i32
    return %arg0, %c0_i32 : i32, i32
  }
}

</mosaic_0001>

<bundles_post_ra>
// kernel: _ema_step.1
= control target key start
LH: loop header
LB: loop body
LE: loop exit
PB: predicated region body
PF: predicated region fallthrough
CT: control target
= control target key end

     0   :  { %s74_s0 = inlined_call_operand.vmem [shape: f32[16,128], index: 0, kind: input, shape index: {}, may-alias: {0,3}]   ;;  %s75_s1 = inlined_call_operand.vmem [shape: f32[16,128], index: 1, kind: input, shape index: {}]   ;;  %s76_s2 = inlined_call_operand.<no memory space> [shape: f32[1], index: 2, kind: input, shape index: {}]   ;;  %s77_s3 = inlined_call_operand.vmem [shape: f32[16,128], index: 3, kind: output, shape index: {}, may-alias: {0,3}]  }
   0x1   :  { %v16_v0 = vld [vmem:[%s74_s0] sm:$0xff]  ;;  %v22_v2 = vstv %s76_s2  ;;  %v17_v3 = vld [vmem:[%s74_s0 + $0x8] sm:$0xff] }
   0x2   :  { %v18_v1 = vld [vmem:[%s75_s1] sm:$0xff]  ;;  %v19_v5 = vld [vmem:[%s75_s1 + $0x8] sm:$0xff] }
   0x3   :  { %v20_v4 = vsub.f32 %v16_v0, %v18_v1  ;;  %v21_v6 = vsub.f32 %v17_v3, %v19_v5 }
   0x5   :  { %v23_v7 = vmul.f32 %v22_v2, %v20_v4  ;;  %v24_v8 = vmul.f32 %v22_v2, %v21_v6 }
   0x7   :  { %v25_v9 = vsub.f32 %v16_v0, %v23_v7  ;;  %v26_v10 = vsub.f32 %v17_v3, %v24_v8 }
   0x9   :  { %27 = vst [vmem:[%s77_s3] sm:$0xff] %v25_v9  ;;  %28 = vst [vmem:[%s77_s3 + $0x8] sm:$0xff] %v26_v10 }

</bundles_post_ra>
